<compile_context>
chip_gen: v7x
topology: tpu7x:2x2x1
jax: 0.10.0
libtpu: 0.0.40
codegen_flags: <defaults>
</compile_context>

<pallas_src>
import math

import jax
import jax.numpy as jnp
from jax.experimental import pallas as pl
from jax.experimental.pallas import tpu as pltpu


def _round_up(x, m):
    return ((x + m - 1) // m) * m


def _size_embedder_kernel(s_ref, freqs_ref, w1_ref, b1_ref, w2_ref, b2_ref, out_ref):
    half = freqs_ref.shape[1]

    # sinusoidal embedding (no concat: feed cos/sin halves to separate dots)
    args = s_ref[...] * freqs_ref[...]                   # (N_pad, half) f32
    cos_e = jnp.cos(args).astype(w1_ref.dtype)           # bf16 MXU operands
    sin_e = jnp.sin(args).astype(w1_ref.dtype)

    h = (jnp.dot(cos_e, w1_ref[0:half, :], preferred_element_type=jnp.float32)
         + jnp.dot(sin_e, w1_ref[half:2 * half, :], preferred_element_type=jnp.float32)
         + b1_ref[...])                                  # (N_pad, hidden) f32

    h = h * jax.nn.sigmoid(h)                            # SiLU in f32

    out = jnp.dot(h.astype(w2_ref.dtype), w2_ref[...],
                  preferred_element_type=jnp.float32) + b2_ref[...]
    out_ref[...] = out.astype(out_ref.dtype)             # lane-dense (Hpad % 128 == 0)


def _size_embedder_pallas(s_flat, freqs, w1, b1, w2, b2, *, max_col_tile_blocks=4):
    N_pad = s_flat.shape[0]
    hidden = w1.shape[1]
    hidden_pad = w2.shape[1]                             # multiple of 128

    # largest column tile (multiple of 128, <= max_col_tile_blocks*128) dividing hidden_pad
    n_blocks = hidden_pad // 128
    tn_blocks = 1
    for t in range(min(max_col_tile_blocks, n_blocks), 0, -1):
        if n_blocks % t == 0:
            tn_blocks = t
            break
    tn = 128 * tn_blocks
    grid = (hidden_pad // tn,)

    return pl.pallas_call(
        _size_embedder_kernel,
        out_shape=jax.ShapeDtypeStruct((N_pad, hidden_pad), jnp.float32),
        grid=grid,
        in_specs=[
            pl.BlockSpec(s_flat.shape, lambda j: (0, 0)),   # resident across grid
            pl.BlockSpec(freqs.shape, lambda j: (0, 0)),
            pl.BlockSpec(w1.shape, lambda j: (0, 0)),
            pl.BlockSpec(b1.shape, lambda j: (0, 0)),
            pl.BlockSpec((hidden, tn), lambda j: (0, j)),   # column tile of w2
            pl.BlockSpec((1, tn), lambda j: (0, j)),
        ],
        out_specs=pl.BlockSpec((N_pad, tn), lambda j: (0, j)),
        compiler_params=pltpu.CompilerParams(
            dimension_semantics=("parallel",)),
    )(s_flat, freqs, w1, b1, w2, b2)


def size_embedder_forward(s, bs, params, frequency_embedding_size=256,
                          param_dtype=jnp.bfloat16):
    """Mirrors SizeEmbedder.forward(s, bs)."""
    w1, b1, w2, b2 = params
    hidden = w2.shape[1]
    assert frequency_embedding_size % 2 == 0, "odd frequency_embedding_size unsupported"
    # TODO(synk): zero-pad extra column for odd frequency_embedding_size (PyTorch path).

    if s.ndim == 1:
        s = s[:, None]
    assert s.ndim == 2
    if s.shape[0] != bs:
        s = jnp.tile(s, (bs // s.shape[0], 1))    # == torch .repeat(bs//s0, 1)
        assert s.shape[0] == bs
    b, dims = s.shape

    N = b * dims
    N_pad = _round_up(max(N, 16), 16)             # sublane-aligned rows (bf16 operands)
    hidden_pad = _round_up(hidden, 128)           # lane-dense output stores

    s_flat = s.reshape(N, 1).astype(jnp.float32)  # 'b d -> (b d)'
    s_flat = jnp.pad(s_flat, ((0, N_pad - N), (0, 0)))

    half = frequency_embedding_size // 2
    freqs = jnp.exp(
        -math.log(10000.0) * jnp.arange(half, dtype=jnp.float32) / half
    ).reshape(1, half)

    # bf16 weights (halves HBM streaming); biases stay f32, added post-accumulation.
    w1_k = w1.astype(param_dtype)
    b1_k = b1.reshape(1, hidden).astype(jnp.float32)
    w2_k = jnp.pad(w2, ((0, 0), (0, hidden_pad - hidden))).astype(param_dtype)
    b2_k = jnp.pad(b2, (0, hidden_pad - hidden)).reshape(1, hidden_pad).astype(jnp.float32)

    out_pad = _size_embedder_pallas(s_flat, freqs, w1_k, b1_k, w2_k, b2_k)
    out = out_pad[:N, :hidden]
    return out.reshape(b, dims * hidden)          # '(b d) d2 -> b (d d2)'


def init_params(key, hidden_size, frequency_embedding_size=256):
    k1, k2, k3, k4 = jax.random.split(key, 4)
    lim1 = 1.0 / math.sqrt(frequency_embedding_size)
    lim2 = 1.0 / math.sqrt(hidden_size)
    # stored as (in, out); PyTorch nn.Linear stores (out, in) — semantics identical.
    w1 = jax.random.uniform(k1, (frequency_embedding_size, hidden_size),
                            jnp.float32, -lim1, lim1)
    b1 = jax.random.uniform(k2, (hidden_size,), jnp.float32, -lim1, lim1)
    w2 = jax.random.uniform(k3, (hidden_size, hidden_size),
                            jnp.float32, -lim2, lim2)
    b2 = jax.random.uniform(k4, (hidden_size,), jnp.float32, -lim2, lim2)
    return (w1, b1, w2, b2)


def _reference_forward(s, bs, params, frequency_embedding_size=256,
                       param_dtype=jnp.float32):
    """Pure-JAX reference; param_dtype mirrors the kernel's weight precision."""
    w1, b1, w2, b2 = params
    hidden = w2.shape[1]
    if s.ndim == 1:
        s = s[:, None]
    if s.shape[0] != bs:
        s = jnp.tile(s, (bs // s.shape[0], 1))
    b, dims = s.shape
    t = s.reshape(-1).astype(jnp.float32)
    half = frequency_embedding_size // 2
    freqs = jnp.exp(-math.log(10000.0) * jnp.arange(half, dtype=jnp.float32) / half)
    args = t[:, None] * freqs[None]
    emb = jnp.concatenate([jnp.cos(args), jnp.sin(args)], axis=-1).astype(param_dtype)
    h = jnp.dot(emb, w1.astype(param_dtype),
                preferred_element_type=jnp.float32) + b1
    h = h * jax.nn.sigmoid(h)
    out = jnp.dot(h.astype(param_dtype), w2.astype(param_dtype),
                  preferred_element_type=jnp.float32) + b2
    return out.reshape(b, dims * hidden)


if __name__ == "__main__":
    key = jax.random.PRNGKey(0)
    hidden_size = 32
    freq_size = 256
    bs = 2

    pkey, skey = jax.random.split(key)
    params = init_params(pkey, hidden_size, freq_size)

    # s: one (height, width)-style pair of sizes, broadcast to batch size bs.
    s = jax.random.uniform(skey, (1, 2), jnp.float32, 0.0, 512.0)

    out = size_embedder_forward(s, bs, params, freq_size)
    out = jax.block_until_ready(out)
    assert out.shape == (bs, 2 * hidden_size), out.shape

    # Tight check vs. a reference with the same bf16 weight policy.
    ref_bf16 = _reference_forward(s, bs, params, freq_size, param_dtype=jnp.bfloat16)
    assert jnp.allclose(out, ref_bf16, atol=1e-2, rtol=1e-2), \
        float(jnp.max(jnp.abs(out - ref_bf16)))

    # Loose check vs. the full-f32 reference (bf16 weight quantization noise only).
    ref_f32 = _reference_forward(s, bs, params, freq_size, param_dtype=jnp.float32)
    assert jnp.allclose(out, ref_f32, atol=5e-2, rtol=5e-2), \
        float(jnp.max(jnp.abs(out - ref_f32)))

    print("KERNEL_OK")
</pallas_src>

<mosaic_0001>
module attributes {stable_mosaic.version = 11 : i64} {
  func.func @_size_embedder_kernel(%arg0: i32, %arg1: memref<16x1xf32, #tpu.memory_space<vmem>>, %arg2: memref<1x128xf32, #tpu.memory_space<vmem>>, %arg3: memref<256x32xbf16, #tpu.memory_space<vmem>>, %arg4: memref<1x32xf32, #tpu.memory_space<vmem>>, %arg5: memref<32x128xbf16, #tpu.memory_space<vmem>>, %arg6: memref<1x128xf32, #tpu.memory_space<vmem>>, %arg7: memref<16x128xf32, #tpu.memory_space<vmem>>) attributes {dimension_semantics = [#tpu.dimension_semantics<parallel>], iteration_bounds = array<i64: 1>, scalar_prefetch = 0 : i64, scratch_operands = 0 : i64, tpu.core_type = #tpu.core_type<tc>, window_params = [{pipeline_mode = #tpu.pipeline_mode<synchronous>, transform_indices = @transform_0, window_bounds = array<i64: 16, 1>}, {pipeline_mode = #tpu.pipeline_mode<synchronous>, transform_indices = @transform_1, window_bounds = array<i64: 1, 128>}, {pipeline_mode = #tpu.pipeline_mode<synchronous>, transform_indices = @transform_2, window_bounds = array<i64: 256, 32>}, {pipeline_mode = #tpu.pipeline_mode<synchronous>, transform_indices = @transform_3, window_bounds = array<i64: 1, 32>}, {transform_indices = @transform_4, window_bounds = array<i64: 32, 128>}, {transform_indices = @transform_5, window_bounds = array<i64: 1, 128>}, {transform_indices = @transform_6, window_bounds = array<i64: 16, 128>}]} {
    %c0 = arith.constant 0 : index
    %c0_0 = arith.constant 0 : index
    %0 = vector.load %arg1[%c0, %c0_0] : memref<16x1xf32, #tpu.memory_space<vmem>>, vector<16x1xf32>
    %c0_1 = arith.constant 0 : index
    %c0_2 = arith.constant 0 : index
    %1 = vector.load %arg2[%c0_1, %c0_2] : memref<1x128xf32, #tpu.memory_space<vmem>>, vector<1x128xf32>
    %2 = vector.broadcast %0 : vector<16x1xf32> to vector<16x128xf32>
    %3 = vector.broadcast %1 : vector<1x128xf32> to vector<16x128xf32>
    %4 = arith.mulf %2, %3 : vector<16x128xf32>
    %5 = math.cos %4 : vector<16x128xf32>
    %6 = arith.truncf %5 : vector<16x128xf32> to vector<16x128xbf16>
    %7 = math.sin %4 : vector<16x128xf32>
    %8 = arith.truncf %7 : vector<16x128xf32> to vector<16x128xbf16>
    %c0_3 = arith.constant 0 : index
    %c0_4 = arith.constant 0 : index
    %9 = vector.load %arg3[%c0_3, %c0_4] : memref<256x32xbf16, #tpu.memory_space<vmem>>, vector<128x32xbf16>
    %cst = arith.constant dense<0.000000e+00> : vector<16x32xf32>
    %10 = tpu.matmul %6, %9, %cst {dimension_numbers = #tpu.dot_dimension_numbers<[1], [0], [0], [1], [0, 0, 1, 1], [], []>} : vector<16x128xbf16>, vector<128x32xbf16>, vector<16x32xf32> -> vector<16x32xf32>
    %c128 = arith.constant 128 : index
    %c0_5 = arith.constant 0 : index
    %11 = vector.load %arg3[%c128, %c0_5] : memref<256x32xbf16, #tpu.memory_space<vmem>>, vector<128x32xbf16>
    %cst_6 = arith.constant dense<0.000000e+00> : vector<16x32xf32>
    %12 = tpu.matmul %8, %11, %cst_6 {dimension_numbers = #tpu.dot_dimension_numbers<[1], [0], [0], [1], [0, 0, 1, 1], [], []>} : vector<16x128xbf16>, vector<128x32xbf16>, vector<16x32xf32> -> vector<16x32xf32>
    %13 = arith.addf %10, %12 : vector<16x32xf32>
    %c0_7 = arith.constant 0 : index
    %c0_8 = arith.constant 0 : index
    %14 = vector.load %arg4[%c0_7, %c0_8] : memref<1x32xf32, #tpu.memory_space<vmem>>, vector<1x32xf32>
    %15 = vector.broadcast %14 : vector<1x32xf32> to vector<16x32xf32>
    %16 = arith.addf %13, %15 : vector<16x32xf32>
    %17 = arith.negf %16 : vector<16x32xf32>
    %18 = math.exp %17 : vector<16x32xf32>
    %cst_9 = arith.constant 1.000000e+00 : f32
    %19 = vector.broadcast %cst_9 : f32 to vector<16x32xf32>
    %20 = arith.addf %19, %18 : vector<16x32xf32>
    %21 = arith.divf %19, %20 : vector<16x32xf32>
    %22 = arith.mulf %16, %21 : vector<16x32xf32>
    %23 = arith.truncf %22 : vector<16x32xf32> to vector<16x32xbf16>
    %c0_10 = arith.constant 0 : index
    %c0_11 = arith.constant 0 : index
    %24 = vector.load %arg5[%c0_10, %c0_11] : memref<32x128xbf16, #tpu.memory_space<vmem>>, vector<32x128xbf16>
    %cst_12 = arith.constant dense<0.000000e+00> : vector<16x128xf32>
    %25 = tpu.matmul %23, %24, %cst_12 {dimension_numbers = #tpu.dot_dimension_numbers<[1], [0], [0], [1], [0, 0, 1, 1], [], []>} : vector<16x32xbf16>, vector<32x128xbf16>, vector<16x128xf32> -> vector<16x128xf32>
    %c0_13 = arith.constant 0 : index
    %c0_14 = arith.constant 0 : index
    %26 = vector.load %arg6[%c0_13, %c0_14] : memref<1x128xf32, #tpu.memory_space<vmem>>, vector<1x128xf32>
    %27 = vector.broadcast %26 : vector<1x128xf32> to vector<16x128xf32>
    %28 = arith.addf %25, %27 : vector<16x128xf32>
    %c0_15 = arith.constant 0 : index
    %c0_16 = arith.constant 0 : index
    %29 = vector.load %arg7[%c0_15, %c0_16] : memref<16x128xf32, #tpu.memory_space<vmem>>, vector<16x128xf32>
    tpu.vector_store %arg7[%c0_15, %c0_16], %28 {strides = array<i32>} : memref<16x128xf32, #tpu.memory_space<vmem>>, vector<16x128xf32>,
    return
  }
  func.func @transform_0(%arg0: i32) -> (i32, i32) {
    %c0_i32 = arith.constant 0 : i32
    %c0_i32_0 = arith.constant 0 : i32
    %c0_i32_1 = arith.constant 0 : i32
    return %c0_i32, %c0_i32_0 : i32, i32
  }
  func.func @transform_1(%arg0: i32) -> (i32, i32) {
    %c0_i32 = arith.constant 0 : i32
    %c0_i32_0 = arith.constant 0 : i32
    %c0_i32_1 = arith.constant 0 : i32
    return %c0_i32, %c0_i32_0 : i32, i32
  }
  func.func @transform_2(%arg0: i32) -> (i32, i32) {
    %c0_i32 = arith.constant 0 : i32
    %c0_i32_0 = arith.constant 0 : i32
    %c0_i32_1 = arith.constant 0 : i32
    return %c0_i32, %c0_i32_0 : i32, i32
  }
  func.func @transform_3(%arg0: i32) -> (i32, i32) {
    %c0_i32 = arith.constant 0 : i32
    %c0_i32_0 = arith.constant 0 : i32
    %c0_i32_1 = arith.constant 0 : i32
    return %c0_i32, %c0_i32_0 : i32, i32
  }
  func.func @transform_4(%arg0: i32) -> (i32, i32) {
    %c0_i32 = arith.constant 0 : i32
    %c0_i32_0 = arith.constant 0 : i32
    return %c0_i32, %arg0 : i32, i32
  }
  func.func @transform_5(%arg0: i32) -> (i32, i32) {
    %c0_i32 = arith.constant 0 : i32
    %c0_i32_0 = arith.constant 0 : i32
    return %c0_i32, %arg0 : i32, i32
  }
  func.func @transform_6(%arg0: i32) -> (i32, i32) {
    %c0_i32 = arith.constant 0 : i32
    %c0_i32_0 = arith.constant 0 : i32
    return %c0_i32, %arg0 : i32, i32
  }
}

</mosaic_0001>

<bundles_post_ra>
// kernel: tpu_custom_call.1
= control target key start
LH: loop header
LB: loop body
LE: loop exit
PB: predicated region body
PF: predicated region fallthrough
CT: control target
= control target key end

     0   :  { %v970_v1 = vmov 0   ;;  %s1199_s0 = inlined_call_operand.vmem [shape: f32[16,1], index: 0, kind: input, shape index: {}]   ;;  %s1200_s1 = inlined_call_operand.vmem [shape: f32[1,128], index: 1, kind: input, shape index: {}]   ;;  %s1201_s2 = inlined_call_operand.vmem [shape: bf16[256,32], index: 2, kind: input, shape index: {}]   ;;  %s1202_s3 = inlined_call_operand.vmem [shape: f32[1,32], index: 3, kind: input, shape index: {}]   ;;  %s1203_s4 = inlined_call_operand.vmem [shape: bf16[32,128], index: 4, kind: input, shape index: {}]   ;;  %s1204_s5 = inlined_call_operand.vmem [shape: f32[1,128], index: 5, kind: input, shape index: {}]   ;;  %s1205_s6 = inlined_call_operand.hbm [shape: f32[16,128], index: 6, kind: output, shape index: {}]  }
   0x1   :  { %v25_v0 = vld [vmem:[%s1199_s0] sm:$0xff]  ;;  %911 = vset.pattern.permute.xlu0 %v970_v1  ;;  %v26_v2 = vld [vmem:[%s1199_s0 + $0x8] sm:$0xff] }
   0x2   :  { %30 = vperm.xlu0 %911, %v25_v0  }
   0x6   :  { %35 = vperm.xlu0 %911, %v26_v2  }
   0x7   :  { %11 = vsyncpa [#allocation3], 0  ;;  %v912_v3 = vld [vmem:[%s1201_s2 + $0x40] sm:$0xff]   ;;  %v971_v5 = vmov 0.0   ;;  %v914_v6 = vld [vmem:[%s1201_s2 + $0x48] sm:$0xff]   ;;  %vm972_vm0 = vmmov 0  }
   0x8   :  { %v913_v4 = vld [vmem:[%s1201_s2] sm:$0xff]   ;;  %843 = vmatprep.subr.bf16.mxu0 %v971_v5  ;;  %863 = vmatprep.subr.bf16.mxu1 %v971_v5  ;;  %v915_v7 = vld [vmem:[%s1201_s2 + $0x8] sm:$0xff]   ;;  %v916_v8 = vld [vmem:[%s1201_s2 + $0x50] sm:$0xff]   ;;  %v973_v41 = vmov 683565275   ;;  %s979_s13 = smov [#allocation2]  }
   0x9   :  { %844 = vmatpush3.bf16.msra.mxu0 %v912_v3  ;;  %864 = vmatpush3.bf16.msra.mxu1 %v913_v4  ;;  %v917_v9 = vld [vmem:[%s1201_s2 + $0x10] sm:$0xff]   ;;  %v918_v10 = vld [vmem:[%s1201_s2 + $0x58] sm:$0xff]   ;;  %v920_v12 = vld [vmem:[%s1201_s2 + $0x60] sm:$0xff]   ;;  %v974_v45 = vmov 2475754826   ;;  %s771_s14 = sshll.u32 %s979_s13, 4  ;;  %s772_s14 = int_to_ptr.vmem [resolvable:$true] %s771_s14 }
   0xa   :  { %845 = vmatprep.subr.bf16.mxu0 %v971_v5  ;;  %865 = vmatprep.subr.bf16.mxu1 %v971_v5  ;;  %v919_v11 = vld [vmem:[%s1201_s2 + $0x18] sm:$0xff]   ;;  %v921_v13 = vld [vmem:[%s1201_s2 + $0x20] sm:$0xff]   ;;  %v922_v14 = vld [vmem:[%s1201_s2 + $0x68] sm:$0xff]   ;;  %v975_v47 = vmov 2131351028   ;;  %s946_s15 = scalar_lea.vmem %s772_s14, 256  ;;  %p951_p1 = scmp.lt.s32.totalorder %s772_s14, %s772_s14 }
   0xb   :  { %859 = vmatprep.mubr.msk.bf16.mxu0 %vm972_vm0, %v971_v5  ;;  %879 = vmatprep.mubr.msk.bf16.mxu1 %vm972_vm0, %v971_v5  ;;  %v923_v15 = vld [vmem:[%s1201_s2 + $0x28] sm:$0xff]   ;;  %v924_v16 = vld [vmem:[%s1201_s2 + $0x70] sm:$0xff]   ;;  %v926_v18 = vld [vmem:[%s1201_s2 + $0x78] sm:$0xff]   ;;  %v976_v49 = vmov 2102212464   ;;  %p947_p0 = scmp.ne.s32.totalorder %s772_s14, %s946_s15  ;;  %p952_p2 = scmp.lt.s32.totalorder %s946_s15, %s946_s15 }
   0xc   :  { %v925_v17 = vld [vmem:[%s1201_s2 + $0x30] sm:$0xff]   ;;  %v927_v19 = vld [vmem:[%s1201_s2 + $0x38] sm:$0xff]   ;;  %v782_v20 = vld [vmem:[%s1200_s1] ss:$0 sm:$0xff]  ;;  %v977_v51 = vmov 920167782  }
   0xd   :  { %846 = vmatpush3.bf16.msra.mxu0 %v914_v6  ;;  %866 = vmatpush3.bf16.msra.mxu1 %v915_v7  ;;  %v978_v58 = vmov 1326507024   ;;  %p953_p3 = por %p952_p2, %p951_p1 }
   0xe   :  { %847 = vmatprep.subr.bf16.mxu0 %v971_v5  ;;  %867 = vmatprep.subr.bf16.mxu1 %v971_v5 }
   0xf   :  { %p954_p4 = pnand %p953_p3, %p947_p0 }
  0x11   :  { %848 = vmatpush3.bf16.msra.mxu0 %v916_v8  ;;  %868 = vmatpush3.bf16.msra.mxu1 %v917_v9 }
  0x12   :  { %849 = vmatprep.subr.bf16.mxu0 %v971_v5  ;;  %869 = vmatprep.subr.bf16.mxu1 %v971_v5 }
  0x15   :  { %850 = vmatpush3.bf16.msra.mxu0 %v918_v10  ;;  %870 = vmatpush3.bf16.msra.mxu1 %v919_v11 }
  0x16   :  { %851 = vmatprep.subr.bf16.mxu0 %v971_v5  ;;  %871 = vmatprep.subr.bf16.mxu1 %v971_v5 }
  0x19   :  { %852 = vmatpush3.bf16.msra.mxu0 %v920_v12  ;;  %872 = vmatpush3.bf16.msra.mxu1 %v921_v13 }
  0x1a   :  { %853 = vmatprep.subr.bf16.mxu0 %v971_v5  ;;  %873 = vmatprep.subr.bf16.mxu1 %v971_v5 }
  0x1d   :  { %854 = vmatpush3.bf16.msra.mxu0 %v922_v14  ;;  %874 = vmatpush3.bf16.msra.mxu1 %v923_v15 }
  0x1e   :  { %855 = vmatprep.subr.bf16.mxu0 %v971_v5  ;;  %875 = vmatprep.subr.bf16.mxu1 %v971_v5 }
  0x21   :  { %856 = vmatpush3.bf16.msra.mxu0 %v924_v16  ;;  %876 = vmatpush3.bf16.msra.mxu1 %v925_v17 }
  0x22   :  { %857 = vmatprep.subr.bf16.mxu0 %v971_v5  ;;  %877 = vmatprep.subr.bf16.mxu1 %v971_v5 }
  0x25   :  { %858 = vmatpush3.bf16.msra.mxu0 %v926_v18  ;;  %878 = vmatpush3.bf16.msra.mxu1 %v927_v19 }
  0x26   :  { %883 = vmatprep.subr.bf16.mxu0 %v971_v5 }
  0x81   :  { %v31_v21 = vpop.permute.xlu0 %30 }
  0x82   :  { %v1095_v22 = vmul.f32 %v782_v20, %v31_v21 }
  0x84   :  { %v46_v23 = vand.u32 2147483647, %v1095_v22  ;;  %v49_v24 = vand.u32 2139095040, %v1095_v22  ;;  %vm48_vm15 = vcmp.lt.s32.totalorder %v1095_v22, 0 }
  0x85   :  { %v36_v25 = vpop.permute.xlu0 %35 }
  0x86   :  { %v50_v26 = vshrl.u32 %v49_v24, 23  ;;  %v1099_v27 = vmul.f32 %v782_v20, %v36_v25  ;;  %v53_v28 = vand.u32 8388607, %v46_v23 }
  0x88   :  { %v783_v29 = vadd.s32 4294967169, %v50_v26  ;;  %v152_v30 = vand.u32 2139095040, %v1099_v27  ;;  %v54_v32 = vor.u32 8388608, %v53_v28  ;;  %v149_v34 = vand.u32 2147483647, %v1099_v27 }
  0x8a   :  { %v56_v31 = vadd.s32 1, %v783_v29  ;;  %v153_v33 = vshrl.u32 %v152_v30, 23  ;;  %v1105_v39 = vshll.u32 %v54_v32, 8  ;;  %v156_v43 = vand.u32 8388607, %v149_v34 }
  0x8c   :  { %vm57_vm1 = vcmp.gt.s32.totalorder %v56_v31, 0  ;;  %v787_v36 = vadd.s32 4294967169, %v153_v33  ;;  %v157_v10 = vor.u32 8388608, %v156_v43 }
  0x8d   :  { %v58_v35 = vsel %vm57_vm1, %v56_v31, 0  ;;  %vm1153_vm1 = vcmp.le.f32.partialorder %v46_v23, 0.7853982 }
  0x8e   :  { %v59_v37 = vshrl.u32 %v58_v35, 5  ;;  %v60_v38 = vand.u32 31, %v58_v35  ;;  %v159_v44 = vadd.s32 1, %v787_v36  ;;  %v197_v25 = vshll.u32 %v157_v10, 8 }
  0x90   :  { %v61_v40 = vsub.s32 32, %v60_v38  ;;  %v63_v42 = vshll.u32 %v973_v41, %v60_v38  ;;  %v66_v46 = vshll.u32 %v974_v45, %v60_v38  ;;  %v69_v48 = vshll.u32 %v975_v47, %v60_v38 }
  0x91   :  { %v72_v50 = vshll.u32 %v976_v49, %v60_v38  ;;  %v75_v52 = vshll.u32 %v977_v51, %v60_v38  ;;  %vm78_vm2 = vcmp.lt.s32.totalorder %v59_v37, 1  ;;  %vm80_vm3 = vcmp.lt.s32.totalorder %v59_v37, 3 }
  0x92   :  { %v64_v53 = vshrl.u32 %v974_v45, %v61_v40  ;;  %v67_v54 = vshrl.u32 %v975_v47, %v61_v40  ;;  %v70_v55 = vshrl.u32 %v976_v49, %v61_v40  ;;  %v62_v56 = vshrl.u32 %v973_v41, %v61_v40 }
  0x93   :  { %v73_v57 = vshrl.u32 %v977_v51, %v61_v40  ;;  %v76_v59 = vshrl.u32 %v978_v58, %v61_v40  ;;  %vm160_vm4 = vcmp.gt.s32.totalorder %v159_v44, 0  ;;  %vm81_vm5 = vcmp.lt.s32.totalorder %v59_v37, 4 }
  0x94   :  { %v65_v60 = vor.u32 %v64_v53, %v63_v42  ;;  %v68_v61 = vor.u32 %v67_v54, %v66_v46  ;;  %v71_v62 = vor.u32 %v70_v55, %v69_v48  ;;  %v161_v1 = vsel %vm160_vm4, %v159_v44, 0 }
  0x95   :  { %v74_v63 = vor.u32 %v73_v57, %v72_v50  ;;  %v77_v0 = vor.u32 %v76_v59, %v75_v52  ;;  %vm79_vm6 = vcmp.lt.s32.totalorder %v59_v37, 2  ;;  %v163_v13 = vand.u32 31, %v161_v1 }
  0x96   :  { %v82_v2 = vsel %vm78_vm2, %v62_v56, %v65_v60  ;;  %v83_v3 = vsel %vm81_vm5, %v71_v62, 2102212464  ;;  %v86_v4 = vsel %vm78_vm2, %v65_v60, %v68_v61  ;;  %v90_v6 = vsel %vm78_vm2, %v68_v61, %v71_v62 }
  0x97   :  { %v84_v7 = vsel %vm80_vm3, %v68_v61, %v83_v3  ;;  %v87_v8 = vsel %vm81_vm5, %v74_v63, 920167782  ;;  %v91_v9 = vsel %vm81_vm5, %v77_v0, 1326507024  ;;  %v162_v21 = vshrl.u32 %v161_v1, 5 }
  0x98   :  { %v88_v11 = vsel %vm80_vm3, %v71_v62, %v87_v8  ;;  %v92_v12 = vsel %vm80_vm3, %v74_v63, %v91_v9  ;;  %v85_v14 = vsel %vm79_vm6, %v82_v2, %v84_v7  ;;  %v164_v24 = vsub.s32 32, %v163_v13 }
  0x99   :  { %v89_v15 = vsel %vm79_vm6, %v86_v4, %v88_v11  ;;  %v93_v16 = vsel %vm79_vm6, %v90_v6, %v92_v12  ;;  %v101_v26 = vmul.u32 %v1105_v39, %v85_v14  ;;  %v166_v28 = vshll.u32 %v973_v41, %v163_v13 }
  0x9a   :  { %v1118_v17 = vmul.u32.u64.low %v1105_v39, %v93_v16  ;;  %v1119_v18 = vmul.u32.u64.high %v1105_v39, %v93_v16, %v1118_v17  ;;  %v1122_v19 = vmul.u32.u64.low %v1105_v39, %v89_v15  ;;  %v1123_v20 = vmul.u32.u64.high %v1105_v39, %v89_v15, %v1122_v19 }
  0x9b   :  { %v169_v29 = vshll.u32 %v974_v45, %v163_v13  ;;  %v172_v30 = vshll.u32 %v975_v47, %v163_v13  ;;  %v167_v31 = vshrl.u32 %v974_v45, %v164_v24  ;;  %v170_v32 = vshrl.u32 %v975_v47, %v164_v24 }
  0x9c   :  { %v173_v33 = vshrl.u32 %v976_v49, %v164_v24  ;;  %v175_v35 = vshll.u32 %v976_v49, %v163_v13  ;;  %vm103_vm7 = vc.u32 %v1119_v18, %v1122_v19  ;;  %v104_v36 = vadd.s32 1, %v1123_v20 }
  0x9d   :  { %v176_v37 = vshrl.u32 %v977_v51, %v164_v24  ;;  %v178_v38 = vshll.u32 %v977_v51, %v163_v13  ;;  %v168_v40 = vor.u32 %v167_v31, %v166_v28  ;;  %v171_v42 = vor.u32 %v170_v32, %v169_v29 }
  0x9e   :  { %v174_v43 = vor.u32 %v173_v33, %v172_v30  ;;  %v179_v44 = vshrl.u32 %v978_v58, %v164_v24  ;;  %v105_v39 = vsel %vm103_vm7, %v104_v36, %v1123_v20  ;;  %vm181_vm8 = vcmp.lt.s32.totalorder %v162_v21, 1 }
  0x9f   :  { %v177_v46 = vor.u32 %v176_v37, %v175_v35  ;;  %vm184_vm9 = vcmp.lt.s32.totalorder %v162_v21, 4  ;;  %v106_v45 = vadd.s32 %v105_v39, %v101_v26  ;;  %vm183_vm10 = vcmp.lt.s32.totalorder %v162_v21, 3 }
  0xa0   :  { %v180_v47 = vor.u32 %v179_v44, %v178_v38  ;;  %v186_v48 = vsel %vm184_vm9, %v174_v43, 2102212464  ;;  %v165_v49 = vshrl.u32 %v973_v41, %v164_v24  ;;  %v189_v50 = vsel %vm181_vm8, %v168_v40, %v171_v42 }
  0xa1   :  { %v190_v52 = vsel %vm184_vm9, %v177_v46, 920167782  ;;  %v193_v53 = vsel %vm181_vm8, %v171_v42, %v174_v43  ;;  %v107_v54 = vadd.s32 536870912, %v106_v45  ;;  %vm182_vm11 = vcmp.lt.s32.totalorder %v162_v21, 2 }
  0xa2   :  { %v191_v51 = vsel %vm183_vm10, %v174_v43, %v190_v52  ;;  %v194_v55 = vsel %vm184_vm9, %v180_v47, 1326507024  ;;  %v185_v56 = vsel %vm181_vm8, %v165_v49, %v168_v40  ;;  %v187_v57 = vsel %vm183_vm10, %v171_v42, %v186_v48 }
  0xa3   :  { %v192_v58 = vsel %vm182_vm11, %v189_v50, %v191_v51  ;;  %v195_v59 = vsel %vm183_vm10, %v177_v46, %v194_v55  ;;  %v1133_v60 = vshrl.u32 %v107_v54, 30  ;;  %v188_v2 = vsel %vm182_vm11, %v185_v56, %v187_v57 }
  0xa4   :  { %v196_v61 = vsel %vm182_vm11, %v193_v53, %v195_v59  ;;  %v1135_v62 = vmul.u32.u64.low %v197_v25, %v192_v58  ;;  %v1136_v63 = vmul.u32.u64.high %v197_v25, %v192_v58, %v1135_v62  ;;  %v204_v6 = vmul.u32 %v197_v25, %v188_v2 }
  0xa5   :  { %v1138_v0 = vmul.u32.u64.low %v197_v25, %v196_v61  ;;  %v1139_v1 = vmul.u32.u64.high %v197_v25, %v196_v61, %v1138_v0  ;;  %v109_v41 = vshll.u32 %v1133_v60, 30  ;;  %v102_v20 = vadd.s32 %v1122_v19, %v1119_v18 }
  0xa6   :  { %v207_v4 = vadd.s32 1, %v1136_v63  ;;  %v132_v54 = vsub.s32 4, %v1133_v60  ;;  %vm151_vm2 = vcmp.lt.s32.totalorder %v1099_v27, 0  ;;  %vm150_vm3 = vcmp.le.f32.partialorder %v149_v34, 0.7853982 }
  0xa7   :  { %v110_v3 = vsub.s32 %v106_v45, %v109_v41  ;;  %vm206_vm12 = vc.u32 %v1139_v1, %v1135_v62  ;;  %v205_v43 = vadd.s32 %v1135_v62, %v1139_v1 }
  0xa8   :  { %v208_v8 = vsel %vm206_vm12, %v207_v4, %v1136_v63  ;;  %v133_v23 = vsel %vm48_vm15, %v132_v54, %v1133_v60 }
  0xa9   :  { %v112_v7 = vsub.s32 0, %v110_v3  ;;  %v209_v9 = vadd.s32 %v208_v8, %v204_v6  ;;  %v135_v61 = vsel %vm1153_vm1, 0, %v133_v23 }
  0xaa   :  { %v346_v1 = vadd.s32 3, %v135_v61  ;;  %v139_v4 = vand.u32 3, %v135_v61 }
  0xab   :  { %v784_v10 = vmin.u32 %v112_v7, %v110_v3  ;;  %v210_v11 = vadd.s32 536870912, %v209_v9 }
  0xac   :  { %vm141_vm6 = vcmp.eq.s32.totalorder %v139_v4, 0  ;;  %vm144_vm7 = vcmp.eq.s32.totalorder %v139_v4, 2  ;;  %vm140_vm9 = vcmp.lt.s32.totalorder %v139_v4, 2 }
  0xad   :  { %v114_v12 = vclz %v784_v10  ;;  %v211_v13 = vshrl.u32 %v210_v11, 30 }
  0xaf   :  { %v785_v14 = vadd.s32 4294967294, %v114_v12  ;;  %v212_v15 = vshll.u32 %v211_v13, 30  ;;  %v235_v57 = vsub.s32 4, %v211_v13 }
  0xb1   :  { %vm786_vm13 = vcmp.lt.s32.totalorder %v785_v14, 0  ;;  %v213_v17 = vsub.s32 %v209_v9, %v212_v15  ;;  %v236_v62 = vsel %vm151_vm2, %v235_v57, %v211_v13 }
  0xb2   :  { %v117_v16 = vsel %vm786_vm13, 0, %v785_v14  ;;  %v238_v0 = vsel %vm150_vm3, 0, %v236_v62 }
  0xb3   :  { %v118_v21 = vsub.s32 32, %v117_v16  ;;  %v122_v24 = vsub.s32 4294967266, %v117_v16  ;;  %v215_v25 = vsub.s32 0, %v213_v17  ;;  %v119_v26 = vshll.u32 %v110_v3, %v117_v16 }
  0xb4   :  { %v450_v60 = vadd.s32 3, %v238_v0  ;;  %v347_v3 = vand.u32 3, %v346_v1  ;;  %v242_v8 = vand.u32 3, %v238_v0 }
  0xb5   :  { %v120_v28 = vshrl.u32 %v102_v20, %v118_v21  ;;  %v123_v29 = vadd.s32 127, %v122_v24  ;;  %v788_v30 = vmin.u32 %v215_v25, %v213_v17 }
  0xb6   :  { %v451_v34 = vand.u32 3, %v450_v60  ;;  %vm349_vm4 = vcmp.eq.s32.totalorder %v347_v3, 0  ;;  %vm352_vm5 = vcmp.eq.s32.totalorder %v347_v3, 2  ;;  %vm348_vm8 = vcmp.lt.s32.totalorder %v347_v3, 2 }
  0xb7   :  { %v121_v31 = vor.u32 %v120_v28, %v119_v26  ;;  %v124_v32 = vshll.u32 %v123_v29, 23  ;;  %v217_v33 = vclz %v788_v30  ;;  %vm244_vm10 = vcmp.eq.s32.totalorder %v242_v8, 0 }
  0xb8   :  { %vm453_vm11 = vcmp.eq.s32.totalorder %v451_v34, 0  ;;  %vm456_vm12 = vcmp.eq.s32.totalorder %v451_v34, 2  ;;  %vm247_vm13 = vcmp.eq.s32.totalorder %v242_v8, 2 }
  0xb9   :  { %v125_v35 = vor.u32 4788187, %v124_v32  ;;  %v789_v36 = vadd.s32 4294967294, %v217_v33  ;;  %v128_v38 = vcvt.s32.f32 %v121_v31 }
  0xbb   :  { %v126_v37 = vand.u32 2147483647, %v125_v35  ;;  %vm790_vm14 = vcmp.lt.s32.totalorder %v789_v36, 0 }
  0xbc   :  { %v220_v42 = vsel %vm790_vm14, 0, %v789_v36  ;;  %vm452_vm14 = vcmp.lt.s32.totalorder %v451_v34, 2 }
  0xbd   :  { %v129_v40 = vmul.f32 %v128_v38, %v126_v37  ;;  %v221_v18 = vsub.s32 32, %v220_v42  ;;  %v225_v19 = vsub.s32 4294967266, %v220_v42  ;;  %v222_v39 = vshll.u32 %v213_v17, %v220_v42  ;;  %v928_v37 = vld [vmem:[%s1203_s4] sm:$0xff]  }
  0xbf   :  { %v130_v44 = vxor.u32 2147483648, %v129_v40  ;;  %v223_v46 = vshrl.u32 %v205_v43, %v221_v18  ;;  %v226_v45 = vadd.s32 127, %v225_v19 }
  0xc1   :  { %v131_v47 = vsel %vm48_vm15, %v130_v44, %v129_v40  ;;  %v224_v49 = vor.u32 %v223_v46, %v222_v39  ;;  %v227_v50 = vshll.u32 %v226_v45, 23  ;;  %vm243_vm15 = vcmp.lt.s32.totalorder %v242_v8, 2  ;;  %v815_v40 = vld [vmem:[%s1202_s3] ss:$0 sm:$0xff] }
  0xc2   :  { %v134_v52 = vsel %vm1153_vm1, %v1095_v22, %v131_v47  ;;  %vm138_vm1 = vweird.f32 %v1095_v22  ;;  %v929_v22 = vld [vmem:[%s1203_s4 + $0x8] sm:$0xff]  }
  0xc3   :  { %v228_v53 = vor.u32 4788187, %v227_v50  ;;  %930 = vcosq.f32 %v134_v52  ;;  %v231_v55 = vcvt.s32.f32 %v224_v49 }
  0xc4   :  { %932 = vsinq.f32 %v134_v52 }
  0xc5   :  { %v229_v51 = vand.u32 2147483647, %v228_v53 }
  0xc7   :  { %v232_v56 = vmul.f32 %v231_v55, %v229_v51 }
  0xc9   :  { %v233_v58 = vxor.u32 2147483648, %v232_v56 }
  0xcb   :  { %v234_v59 = vsel %vm151_vm2, %v233_v58, %v232_v56  ;;  %vm241_vm2 = vweird.f32 %v1099_v27  ;;  %v818_v58 = vld [vmem:[%s1204_s5] ss:$0 sm:$0xff] }
  0xcc   :  { %v237_v63 = vsel %vm150_vm3, %v1099_v27, %v234_v59 }
  0xcd   :  { %934 = vcosq.f32 %v237_v63  ;;  %v931_v41 = vpop.eup %930 }
  0xce   :  { %936 = vsinq.f32 %v237_v63  ;;  %v933_v2 = vpop.eup %932  ;;  %v145_v7 = vxor.u32 2147483648, %v931_v41 }
  0xcf   :  { %v142_v6 = vxor.u32 2147483648, %v933_v2 }
  0xd0   :  { %v354_v11 = vsel %vm352_vm5, %v145_v7, %v933_v2  ;;  %v146_v13 = vsel %vm144_vm7, %v145_v7, %v933_v2 }
  0xd1   :  { %v351_v10 = vsel %vm349_vm4, %v931_v41, %v142_v6  ;;  %v143_v12 = vsel %vm141_vm6, %v931_v41, %v142_v6 }
  0xd2   :  { %v355_v17 = vsel %vm348_vm8, %v351_v10, %v354_v11  ;;  %v147_v21 = vsel %vm140_vm9, %v143_v12, %v146_v13 }
  0xd3   :  { %v356_v30 = vsel %vm138_vm1, nan, %v355_v17  ;;  %v148_v32 = vsel %vm138_vm1, nan, %v147_v21 }
  0xd7   :  { %v935_v9 = vpop.eup %934 }
  0xd8   :  { %v937_v14 = vpop.eup %936  ;;  %v248_v15 = vxor.u32 2147483648, %v935_v9 }
  0xd9   :  { %v245_v16 = vxor.u32 2147483648, %v937_v14 }
  0xda   :  { %v458_v20 = vsel %vm456_vm12, %v248_v15, %v937_v14  ;;  %v249_v24 = vsel %vm247_vm13, %v248_v15, %v937_v14 }
  0xdb   :  { %v455_v25 = vsel %vm453_vm11, %v935_v9, %v245_v16  ;;  %v246_v26 = vsel %vm244_vm10, %v935_v9, %v245_v16 }
  0xdc   :  { %v459_v28 = vsel %vm452_vm14, %v455_v25, %v458_v20  ;;  %v250_v29 = vsel %vm243_vm15, %v246_v26, %v249_v24 }
  0xdd   :  { %v460_v31 = vsel %vm241_vm2, nan, %v459_v28  ;;  %v251_v33 = vsel %vm241_vm2, nan, %v250_v29 }
  0xde   :  { %v461_v35 = vpack.c.bf16 %v460_v31, %v356_v30  ;;  %v252_v36 = vpack.c.bf16 %v251_v33, %v148_v32 }
  0xe0   :  { %860 = vmatmul.mubr.bf16.vlgmr.msra.gmra.mrb[0].mxu0 %v461_v35  ;;  %880 = vmatmul.mubr.bf16.vlgmr.msra.gmra.mrb[0].mxu1 %v252_v36 }
  0xe1   :  { %887 = vmatprep.mubr.msk.bf16.mxu0 %vm972_vm0, %v971_v5  ;;  %884 = vmatpush3.bf16.msra.mxu0 %v928_v37  ;;  %vm719_vm0 = vcmask 261120  }
  0xe2   :  { %885 = vmatprep.subr.bf16.mxu0 %v971_v5 }
  0xe5   :  { %886 = vmatpush3.bf16.msra.mxu0 %v929_v22 }
 0x1b3   :  { %v576_v27 = vpop.f32.mrb[0].mxu0  ;;  %v665_v38 = vpop.f32.mrb[0].mxu1 }
 0x1b4   :  { %v666_v42 = vadd.f32 %v665_v38, %v576_v27  ;;  %v861_v43 = vpop.f32.mrb[1].mxu0  ;;  %v881_v18 = vpop.f32.mrb[1].mxu1 }
 0x1b5   :  { %v579_v19 = vpop.f32.mrb[2].mxu0  ;;  %v668_v44 = vpop.f32.mrb[2].mxu1 }
 0x1b6   :  { %v679_v39 = vadd.f32 %v815_v40, %v666_v42  ;;  %v669_v46 = vadd.f32 %v668_v44, %v579_v19  ;;  %v862_v45 = vpop.f32.mrb[3].mxu0  ;;  %v882_v5 = vpop.f32.mrb[3].mxu1 }
 0x1b8   :  { %v816_v47 = vmul.f32 -1.442695, %v679_v39  ;;  %v680_v48 = vadd.f32 %v815_v40, %v669_v46 }
 0x1ba   :  { %938 = vpow2.f32 %v816_v47  ;;  %v817_v49 = vmul.f32 -1.442695, %v680_v48 }
 0x1bc   :  { %940 = vpow2.f32 %v817_v49 }
 0x1c4   :  { %v939_v50 = vpop.eup %938 }
 0x1c5   :  { %v687_v52 = vadd.f32 1.0, %v939_v50 }
 0x1c6   :  { %v941_v53 = vpop.eup %940 }
 0x1c7   :  { %942 = vrcp.f32 %v687_v52  ;;  %v688_v54 = vadd.f32 1.0, %v941_v53 }
 0x1c9   :  { %944 = vrcp.f32 %v688_v54 }
 0x1d1   :  { %v943_v51 = vpop.eup %942 }
 0x1d2   :  { %v693_v56 = vmul.f32 %v943_v51, %v679_v39 }
 0x1d3   :  { %v945_v55 = vpop.eup %944 }
 0x1d4   :  { %v694_v57 = vmul.f32 %v945_v55, %v680_v48 }
 0x1d6   :  { %v695_v23 = vpack.c.bf16 %v694_v57, %v693_v56 }
 0x1d8   :  { %888 = vmatmul.mubr.msk.bf16.vlgmr.msra.gmra.mrb[4].mxu0 %vm719_vm0, %v695_v23 }
 0x2ab   :  { %v757_v59 = vpop.f32.mrb[4].mxu0 }
 0x2ac   :  { %v758_v61 = vadd.f32 %v818_v58, %v757_v59  ;;  %v889_v62 = vpop.f32.mrb[5].mxu0 }
 0x2ad   :  { %v760_v63 = vpop.f32.mrb[6].mxu0 }
 0x2ae   :  { %764 = vst [vmem:[#allocation2] sm:$0xff] %v758_v61  ;;  %v761_v0 = vadd.f32 %v818_v58, %v760_v63  ;;  %v890_v1 = vpop.f32.mrb[7].mxu0 }
 0x2b0   :  { %765 = vst [vmem:[#allocation2 + $0x8] sm:$0xff] %v761_v0 }
 0x2b1   :  { %957 = shalt.err (!%p954_p4)
}
 0x2b2   :  { %s958_s17 = scalar_lea.hbm %s1205_s6, 256 }
 0x2b3   :  { %p959_p5 = scmp.ne.s32.totalorder %s1205_s6, %s958_s17  ;;  %p962_p6 = scmp.lt.u32.totalorder %s958_s17, %s1205_s6 }
 0x2b5   :  { %p964_p7 = pnand %p962_p6, %p959_p5 }
 0x2b7   :  { %967 = shalt.err (!%p964_p7)
}
 0x2b8   :  { %s980_s22 = smov 128   ;;  %s981_s23 = smov 8  }
 0x2b9   :  { %777 = dma.vmem_to_hbm [thread:$0]  %s772_s14, 256, %s1205_s6, [#allocation3], %s980_s22, %s980_s22, %s981_s23  }
 0x2ba   :  { %968 = dma.done.wait [#allocation3], 256  }
 0x2bb   :  { %969 = vsyncadd [#allocation3], 4294967040 }
 0x2bc   :  { %781 = vsyncpa [#allocation3], 1 }

</bundles_post_ra>
